<compile_context>
chip_gen: v7x
topology: tpu7x:2x2x1
jax: 0.10.0
libtpu: 0.0.40
codegen_flags: <defaults>
</compile_context>

<pallas_src>
import functools

import jax
import jax.numpy as jnp
from jax.experimental import pallas as pl
from jax.experimental.pallas import tpu as pltpu


_LANES = 128
_SUBLANES = 8


def _rmax(x):
    """Max over the last two (tiled) axes, keepdims; leading batch axis live."""
    return jnp.max(jnp.max(x, axis=-1, keepdims=True), axis=1, keepdims=True)


def _rsum(x):
    """Sum over the last two (tiled) axes, keepdims; leading batch axis live."""
    return jnp.sum(jnp.sum(x, axis=-1, keepdims=True), axis=1, keepdims=True)


def _psbl_kernel(bd_ref, out_ref, *, skip, issublevel):
    """One grid step == Gb persistence diagrams, block (2, Gb, R, 128)."""
    births = bd_ref[0]                               # (Gb, R, 128)
    deaths = bd_ref[1]                               # (Gb, R, 128)

    # `issublevel` is a static Python bool -> pick the subtraction at trace time.
    lengths = (deaths - births) if issublevel else (births - deaths)

    # torch semantics: bars with +inf or NaN length become zero-length bars.
    # Padded entries were built so their length is exactly -inf (sentinel):
    # they are neither +inf nor NaN, so they stay -inf and can never be
    # selected as a max nor enter the sum.
    lengths = jnp.where(jnp.logical_or(lengths == jnp.inf, jnp.isnan(lengths)),
                        jnp.float32(0.0), lengths)

    neg_inf = jnp.float32(-jnp.inf)
    zero = jnp.float32(0.0)

    if skip == 0:
        # Fast path: single masked sum-of-squares pass.
        surv = jnp.where(lengths > neg_inf, lengths, zero)
        res = _rsum(surv * surv)                     # (Gb, 1, 1)
    else:
        # --- knock out the top-`skip` DISTINCT values, vectorized over Gb ---
        # Exactly one cross-lane max per iteration sits on the serial chain;
        # the tie count reuses the knockout mask (no extra re-scan later).
        sel = lengths
        maxes, ties = [], []
        for _ in range(skip):
            m = _rmax(sel)                           # (Gb, 1, 1)
            is_m = sel == m
            ties.append(_rsum(jnp.where(is_m, jnp.float32(1.0), zero)))
            maxes.append(m)
            sel = jnp.where(is_m, neg_inf, sel)

        # Direct sum of squares over the survivors (no `total - m*m`
        # cancellation).  NOTE: genuine -inf lengths (e.g. death == -inf under
        # sublevel), which the torch reference would square to +inf, are
        # dropped here -- intentional, documented divergence.
        surv = jnp.where(sel > neg_inf, sel, zero)
        res = _rsum(surv * surv)                     # (Gb, 1, 1)

        # --- tie compensation -------------------------------------------
        # C_i = #bars with length >= m_i = prefix sum of the tie counts
        # (maxima are strictly decreasing, padding never matches a finite m).
        # The true tail keeps (C_j - skip) bars of the cut value m_j (j =
        # first i with C_i >= skip) plus every bar of the values below the
        # cut that the knockout removed.
        skip_f = jnp.float32(skip)
        c = jnp.zeros_like(maxes[0])
        prev_c = jnp.zeros_like(maxes[0])
        found = jnp.zeros(maxes[0].shape, dtype=jnp.bool_)
        for m, t in zip(maxes, ties):
            c = c + t
            finite = m > neg_inf
            is_cut = jnp.logical_and(jnp.logical_not(found), c >= skip_f)
            res = res + jnp.where(jnp.logical_and(is_cut, finite),
                                  (c - skip_f) * m * m, zero)
            res = res + jnp.where(jnp.logical_and(found, finite),
                                  (c - prev_c) * m * m, zero)
            found = jnp.logical_or(found, is_cut)
            prev_c = c

    # Small lane-dense block write: one broadcast, one unmasked vst.
    out_ref[...] = jnp.broadcast_to(res, out_ref.shape)


def _bucket_npad(n):
    """Round the bar count up to a small bucket set (multiples of 8*128) so
    distinct diagram sizes do not each trigger a fresh Mosaic compile."""
    npad = _SUBLANES * _LANES                        # 1024
    while npad < n:
        npad *= 2
    return npad


def partial_squared_barcode_lengths_batched(dgms, issublevel, skip,
                                            *, diagrams_per_step=8):
    """Squared-barcode-length tails for several diagrams in ONE pallas_call.

    dgms: sequence of (N_i, 2) arrays of [birth, death] pairs.
    Returns a (len(dgms),) float32 array.
    """
    skip = int(skip)
    issublevel = bool(issublevel)
    dgms = [jnp.asarray(d, jnp.float32) for d in dgms]
    G = len(dgms)
    ns = [int(d.shape[0]) for d in dgms]
    npad = _bucket_npad(max(ns + [1]))
    R = npad // _LANES                               # multiple of 8

    # Diagrams per grid step: amortize per-step overhead, but keep the
    # double-buffered input block within a conservative budget that fits the
    # default scoped-VMEM limit on every generation (16 MiB on v5e).
    bytes_per_diag = 2 * R * _LANES * 4
    budget = 12 * 1024 * 1024
    Gb = max(1, min(diagrams_per_step, G, budget // (2 * bytes_per_diag)))
    NB = -(-G // Gb)                                 # grid steps
    G_pad = NB * Gb

    # Sentinel padding: the "subtrahend" side is +inf so padded lengths come
    # out as exactly -inf (never selected, never summed).  Extra all-padding
    # diagrams fill the batch up to G_pad; their results are sliced off.
    pad_b = jnp.inf if issublevel else 0.0
    pad_d = 0.0 if issublevel else jnp.inf
    base = jnp.stack(
        [jnp.full((G_pad, npad), pad_b, dtype=jnp.float32),
         jnp.full((G_pad, npad), pad_d, dtype=jnp.float32)], axis=0)
    for i, (d, n) in enumerate(zip(dgms, ns)):
        if n > 0:
            base = base.at[:, i, :n].set(d.T)
    bd = base.reshape(2, G_pad, R, _LANES)           # one stacked input

    in_block = pl.BlockSpec((2, Gb, R, _LANES), lambda g: (0, g, 0, 0))
    out_block = pl.BlockSpec((Gb, 1, _LANES), lambda g: (g, 0, 0))

    # Raise the scoped-VMEM limit only when the double-buffered blocks need it
    # (threshold below v5e's 16 MiB default); cap well under v7x's 64 MiB.
    block_bytes = Gb * 2 * R * _LANES * 4
    out_bytes = Gb * _LANES * 4
    vmem_need = 2 * (block_bytes + out_bytes)
    cp_kwargs = dict(dimension_semantics=("parallel",))
    if vmem_need > 12 * 1024 * 1024:
        cp_kwargs["vmem_limit_bytes"] = min(
            max(vmem_need * 5 // 4 + (2 << 20), 32 << 20), 48 << 20)

    kernel = functools.partial(_psbl_kernel, skip=skip, issublevel=issublevel)
    out = pl.pallas_call(
        kernel,
        out_shape=jax.ShapeDtypeStruct((G_pad, 1, _LANES), jnp.float32),
        grid_spec=pltpu.PrefetchScalarGridSpec(
            num_scalar_prefetch=0,
            grid=(NB,),
            in_specs=[in_block],
            out_specs=out_block,
        ),
        compiler_params=pltpu.CompilerParams(**cp_kwargs),
    )(bd)
    return out[:G, 0, 0]


def partial_squared_barcode_lengths(dgminfo, *, dim, skip):
    """JAX/Pallas equivalent of PartialSquaredBarcodeLengths(dim, skip).forward."""
    dgms, issublevel = dgminfo
    return partial_squared_barcode_lengths_batched([dgms[dim]], issublevel, skip)[0]


def _reference(dgm, issublevel, skip):
    dgm = jnp.asarray(dgm, jnp.float32)
    lengths = (dgm[:, 1] - dgm[:, 0]) if issublevel else (dgm[:, 0] - dgm[:, 1])
    lengths = jnp.where((lengths == jnp.inf) | jnp.isnan(lengths), 0.0, lengths)
    sortl = -jnp.sort(-lengths)
    return jnp.sum(sortl[skip:] ** 2)


if __name__ == "__main__":
    key = jax.random.PRNGKey(0)
    k0, k1, k2, k3 = jax.random.split(key, 4)

    # Deterministic synthetic persistence diagrams.
    N0, N1 = 24, 40
    b0 = jax.random.uniform(k0, (N0,), dtype=jnp.float32)
    d0 = b0 + jnp.abs(jax.random.normal(k1, (N0,), dtype=jnp.float32))
    dgm0 = jnp.stack([b0, d0], axis=1)

    b1 = jax.random.uniform(k2, (N1,), dtype=jnp.float32)
    d1 = b1 + jnp.abs(jax.random.normal(k3, (N1,), dtype=jnp.float32))
    dgm1 = jnp.stack([b1, d1], axis=1)
    # Inject one infinite bar and one NaN bar (both must become zero-length).
    dgm1 = dgm1.at[3, 1].set(jnp.inf)
    dgm1 = dgm1.at[7, 0].set(jnp.nan)
    dgm1 = dgm1.at[7, 1].set(jnp.nan)

    # A diagram with tied longest bars (exercises the tie-compensation path).
    dgm2 = jnp.array([[0.0, 3.0], [0.0, 3.0], [0.0, 3.0],
                      [0.0, 1.0], [0.0, 0.5]], dtype=jnp.float32)
    # Fewer bars than `skip` (result must be exactly 0).
    dgm3 = jnp.array([[0.0, 2.0]], dtype=jnp.float32)

    issublevel = True
    skip = 2

    # Batched: several diagrams / homology dims in a single pallas_call.
    outs = partial_squared_barcode_lengths_batched(
        [dgm0, dgm1, dgm2, dgm3], issublevel, skip)
    outs = jax.block_until_ready(outs)
    for out, dgm in zip(outs, [dgm0, dgm1, dgm2, dgm3]):
        ref = _reference(dgm, issublevel, skip)
        assert jnp.allclose(out, ref, rtol=1e-4, atol=1e-5), (out, ref)

    # skip == 0 fast path.
    out0 = partial_squared_barcode_lengths_batched([dgm0, dgm1], issublevel, 0)
    out0 = jax.block_until_ready(out0)
    for out, dgm in zip(out0, [dgm0, dgm1]):
        ref = _reference(dgm, issublevel, 0)
        assert jnp.allclose(out, ref, rtol=1e-4, atol=1e-5), (out, ref)

    # Superlevel branch (birth > death).
    dgm_sup = jnp.stack([d0, b0], axis=1)
    out_sup = partial_squared_barcode_lengths_batched([dgm_sup], False, 1)
    out_sup = jax.block_until_ready(out_sup)
    ref_sup = _reference(dgm_sup, False, 1)
    assert jnp.allclose(out_sup[0], ref_sup, rtol=1e-4, atol=1e-5), (out_sup, ref_sup)

    # Module-equivalent single-(dim, skip) call.
    dgminfo = ((dgm0, dgm1), issublevel)
    out1 = partial_squared_barcode_lengths(dgminfo, dim=1, skip=skip)
    out1 = jax.block_until_ready(out1)
    ref1 = _reference(dgm1, issublevel, skip)
    assert jnp.allclose(out1, ref1, rtol=1e-4, atol=1e-5), (out1, ref1)

    print("KERNEL_OK")
</pallas_src>

<mosaic_0001>
module attributes {stable_mosaic.version = 11 : i64} {
  func.func @_psbl_kernel(%arg0: i32, %arg1: memref<2x4x8x128xf32, #tpu.memory_space<vmem>>, %arg2: memref<4x1x128xf32, #tpu.memory_space<vmem>>) attributes {dimension_semantics = [#tpu.dimension_semantics<parallel>], iteration_bounds = array<i64: 1>, scalar_prefetch = 0 : i64, scratch_operands = 0 : i64, tpu.core_type = #tpu.core_type<tc>, window_params = [{transform_indices = @transform_0, window_bounds = array<i64: 2, 4, 8, 128>}, {transform_indices = @transform_1, window_bounds = array<i64: 4, 1, 128>}]} {
    %c0 = arith.constant 0 : index
    %c0_0 = arith.constant 0 : index
    %c0_1 = arith.constant 0 : index
    %c0_2 = arith.constant 0 : index
    %0 = vector.load %arg1[%c0, %c0_0, %c0_1, %c0_2] : memref<2x4x8x128xf32, #tpu.memory_space<vmem>>, vector<1x4x8x128xf32>
    %1 = vector.shape_cast %0 : vector<1x4x8x128xf32> to vector<4x8x128xf32>
    %c1 = arith.constant 1 : index
    %c0_3 = arith.constant 0 : index
    %c0_4 = arith.constant 0 : index
    %c0_5 = arith.constant 0 : index
    %2 = vector.load %arg1[%c1, %c0_3, %c0_4, %c0_5] : memref<2x4x8x128xf32, #tpu.memory_space<vmem>>, vector<1x4x8x128xf32>
    %3 = vector.shape_cast %2 : vector<1x4x8x128xf32> to vector<4x8x128xf32>
    %4 = arith.subf %3, %1 : vector<4x8x128xf32>
    %cst = arith.constant 0x7F800000 : f32
    %5 = vector.broadcast %cst : f32 to vector<4x8x128xf32>
    %6 = arith.cmpf oeq, %4, %5 : vector<4x8x128xf32>
    %7 = arith.cmpf one, %4, %4 : vector<4x8x128xf32>
    %8 = arith.ori %6, %7 : vector<4x8x128xi1>
    %cst_6 = arith.constant 0.000000e+00 : f32
    %9 = vector.broadcast %cst_6 : f32 to vector<4x8x128xf32>
    %10 = arith.select %8, %9, %4 : vector<4x8x128xi1>, vector<4x8x128xf32>
    %cst_7 = arith.constant dense<0xFF800000> : vector<4x8xf32>
    %11 = vector.multi_reduction <maximumf>, %10, %cst_7 [2] : vector<4x8x128xf32> to vector<4x8xf32>
    %12 = vector.shape_cast %11 : vector<4x8xf32> to vector<4x8x1xf32>
    %cst_8 = arith.constant dense<0xFF800000> : vector<4x1xf32>
    %13 = vector.multi_reduction <maximumf>, %12, %cst_8 [1] : vector<4x8x1xf32> to vector<4x1xf32>
    %14 = vector.shape_cast %13 : vector<4x1xf32> to vector<4x1x1xf32>
    %15 = vector.broadcast %14 : vector<4x1x1xf32> to vector<4x8x128xf32>
    %16 = arith.cmpf oeq, %10, %15 : vector<4x8x128xf32>
    %cst_9 = arith.constant 1.000000e+00 : f32
    %cst_10 = arith.constant 0.000000e+00 : f32
    %17 = vector.broadcast %cst_9 : f32 to vector<4x8x128xf32>
    %18 = vector.broadcast %cst_10 : f32 to vector<4x8x128xf32>
    %19 = arith.select %16, %17, %18 : vector<4x8x128xi1>, vector<4x8x128xf32>
    %cst_11 = arith.constant dense<0.000000e+00> : vector<4x8xf32>
    %20 = vector.multi_reduction <add>, %19, %cst_11 [2] : vector<4x8x128xf32> to vector<4x8xf32>
    %21 = vector.shape_cast %20 : vector<4x8xf32> to vector<4x8x1xf32>
    %cst_12 = arith.constant dense<0.000000e+00> : vector<4x1xf32>
    %22 = vector.multi_reduction <add>, %21, %cst_12 [1] : vector<4x8x1xf32> to vector<4x1xf32>
    %23 = vector.shape_cast %22 : vector<4x1xf32> to vector<4x1x1xf32>
    %cst_13 = arith.constant 0xFF800000 : f32
    %24 = vector.broadcast %cst_13 : f32 to vector<4x8x128xf32>
    %25 = arith.select %16, %24, %10 : vector<4x8x128xi1>, vector<4x8x128xf32>
    %cst_14 = arith.constant dense<0xFF800000> : vector<4x8xf32>
    %26 = vector.multi_reduction <maximumf>, %25, %cst_14 [2] : vector<4x8x128xf32> to vector<4x8xf32>
    %27 = vector.shape_cast %26 : vector<4x8xf32> to vector<4x8x1xf32>
    %cst_15 = arith.constant dense<0xFF800000> : vector<4x1xf32>
    %28 = vector.multi_reduction <maximumf>, %27, %cst_15 [1] : vector<4x8x1xf32> to vector<4x1xf32>
    %29 = vector.shape_cast %28 : vector<4x1xf32> to vector<4x1x1xf32>
    %30 = vector.broadcast %29 : vector<4x1x1xf32> to vector<4x8x128xf32>
    %31 = arith.cmpf oeq, %25, %30 : vector<4x8x128xf32>
    %cst_16 = arith.constant 1.000000e+00 : f32
    %cst_17 = arith.constant 0.000000e+00 : f32
    %32 = vector.broadcast %cst_16 : f32 to vector<4x8x128xf32>
    %33 = vector.broadcast %cst_17 : f32 to vector<4x8x128xf32>
    %34 = arith.select %31, %32, %33 : vector<4x8x128xi1>, vector<4x8x128xf32>
    %cst_18 = arith.constant dense<0.000000e+00> : vector<4x8xf32>
    %35 = vector.multi_reduction <add>, %34, %cst_18 [2] : vector<4x8x128xf32> to vector<4x8xf32>
    %36 = vector.shape_cast %35 : vector<4x8xf32> to vector<4x8x1xf32>
    %cst_19 = arith.constant dense<0.000000e+00> : vector<4x1xf32>
    %37 = vector.multi_reduction <add>, %36, %cst_19 [1] : vector<4x8x1xf32> to vector<4x1xf32>
    %38 = vector.shape_cast %37 : vector<4x1xf32> to vector<4x1x1xf32>
    %cst_20 = arith.constant 0xFF800000 : f32
    %39 = vector.broadcast %cst_20 : f32 to vector<4x8x128xf32>
    %40 = arith.select %31, %39, %25 : vector<4x8x128xi1>, vector<4x8x128xf32>
    %cst_21 = arith.constant 0xFF800000 : f32
    %41 = vector.broadcast %cst_21 : f32 to vector<4x8x128xf32>
    %42 = arith.cmpf ogt, %40, %41 : vector<4x8x128xf32>
    %cst_22 = arith.constant 0.000000e+00 : f32
    %43 = vector.broadcast %cst_22 : f32 to vector<4x8x128xf32>
    %44 = arith.select %42, %40, %43 : vector<4x8x128xi1>, vector<4x8x128xf32>
    %45 = arith.mulf %44, %44 : vector<4x8x128xf32>
    %cst_23 = arith.constant dense<0.000000e+00> : vector<4x8xf32>
    %46 = vector.multi_reduction <add>, %45, %cst_23 [2] : vector<4x8x128xf32> to vector<4x8xf32>
    %47 = vector.shape_cast %46 : vector<4x8xf32> to vector<4x8x1xf32>
    %cst_24 = arith.constant dense<0.000000e+00> : vector<4x1xf32>
    %48 = vector.multi_reduction <add>, %47, %cst_24 [1] : vector<4x8x1xf32> to vector<4x1xf32>
    %49 = vector.shape_cast %48 : vector<4x1xf32> to vector<4x1x1xf32>
    %cst_25 = arith.constant 0.000000e+00 : f32
    %50 = vector.broadcast %cst_25 : f32 to vector<4x1x1xf32>
    %cst_26 = arith.constant 0.000000e+00 : f32
    %51 = vector.broadcast %cst_26 : f32 to vector<4x1x1xf32>
    %false = arith.constant false
    %52 = vector.broadcast %false : i1 to vector<4x1x1xi1>
    %53 = arith.addf %50, %23 : vector<4x1x1xf32>
    %cst_27 = arith.constant 0xFF800000 : f32
    %54 = vector.broadcast %cst_27 : f32 to vector<4x1x1xf32>
    %55 = arith.cmpf ogt, %14, %54 : vector<4x1x1xf32>
    %cst_28 = arith.constant dense<true> : vector<4x1x1xi1>
    %56 = arith.xori %52, %cst_28 : vector<4x1x1xi1>
    %cst_29 = arith.constant 2.000000e+00 : f32
    %57 = vector.broadcast %cst_29 : f32 to vector<4x1x1xf32>
    %58 = arith.cmpf oge, %53, %57 : vector<4x1x1xf32>
    %59 = arith.andi %56, %58 : vector<4x1x1xi1>
    %60 = arith.andi %59, %55 : vector<4x1x1xi1>
    %cst_30 = arith.constant 2.000000e+00 : f32
    %61 = vector.broadcast %cst_30 : f32 to vector<4x1x1xf32>
    %62 = arith.subf %53, %61 : vector<4x1x1xf32>
    %63 = arith.mulf %62, %14 : vector<4x1x1xf32>
    %64 = arith.mulf %63, %14 : vector<4x1x1xf32>
    %cst_31 = arith.constant 0.000000e+00 : f32
    %65 = vector.broadcast %cst_31 : f32 to vector<4x1x1xf32>
    %66 = arith.select %60, %64, %65 : vector<4x1x1xi1>, vector<4x1x1xf32>
    %67 = arith.addf %49, %66 : vector<4x1x1xf32>
    %68 = arith.andi %52, %55 : vector<4x1x1xi1>
    %69 = arith.subf %53, %51 : vector<4x1x1xf32>
    %70 = arith.mulf %69, %14 : vector<4x1x1xf32>
    %71 = arith.mulf %70, %14 : vector<4x1x1xf32>
    %cst_32 = arith.constant 0.000000e+00 : f32
    %72 = vector.broadcast %cst_32 : f32 to vector<4x1x1xf32>
    %73 = arith.select %68, %71, %72 : vector<4x1x1xi1>, vector<4x1x1xf32>
    %74 = arith.addf %67, %73 : vector<4x1x1xf32>
    %75 = arith.ori %52, %59 : vector<4x1x1xi1>
    %76 = arith.addf %53, %38 : vector<4x1x1xf32>
    %cst_33 = arith.constant 0xFF800000 : f32
    %77 = vector.broadcast %cst_33 : f32 to vector<4x1x1xf32>
    %78 = arith.cmpf ogt, %29, %77 : vector<4x1x1xf32>
    %cst_34 = arith.constant dense<true> : vector<4x1x1xi1>
    %79 = arith.xori %75, %cst_34 : vector<4x1x1xi1>
    %cst_35 = arith.constant 2.000000e+00 : f32
    %80 = vector.broadcast %cst_35 : f32 to vector<4x1x1xf32>
    %81 = arith.cmpf oge, %76, %80 : vector<4x1x1xf32>
    %82 = arith.andi %79, %81 : vector<4x1x1xi1>
    %83 = arith.andi %82, %78 : vector<4x1x1xi1>
    %cst_36 = arith.constant 2.000000e+00 : f32
    %84 = vector.broadcast %cst_36 : f32 to vector<4x1x1xf32>
    %85 = arith.subf %76, %84 : vector<4x1x1xf32>
    %86 = arith.mulf %85, %29 : vector<4x1x1xf32>
    %87 = arith.mulf %86, %29 : vector<4x1x1xf32>
    %cst_37 = arith.constant 0.000000e+00 : f32
    %88 = vector.broadcast %cst_37 : f32 to vector<4x1x1xf32>
    %89 = arith.select %83, %87, %88 : vector<4x1x1xi1>, vector<4x1x1xf32>
    %90 = arith.addf %74, %89 : vector<4x1x1xf32>
    %91 = arith.andi %75, %78 : vector<4x1x1xi1>
    %92 = arith.subf %76, %53 : vector<4x1x1xf32>
    %93 = arith.mulf %92, %29 : vector<4x1x1xf32>
    %94 = arith.mulf %93, %29 : vector<4x1x1xf32>
    %cst_38 = arith.constant 0.000000e+00 : f32
    %95 = vector.broadcast %cst_38 : f32 to vector<4x1x1xf32>
    %96 = arith.select %91, %94, %95 : vector<4x1x1xi1>, vector<4x1x1xf32>
    %97 = arith.addf %90, %96 : vector<4x1x1xf32>
    %98 = vector.shape_cast %97 : vector<4x1x1xf32> to vector<4x1x1xf32>
    %99 = vector.broadcast %98 : vector<4x1x1xf32> to vector<4x1x128xf32>
    %c0_39 = arith.constant 0 : index
    %c0_40 = arith.constant 0 : index
    %c0_41 = arith.constant 0 : index
    %100 = vector.load %arg2[%c0_39, %c0_40, %c0_41] : memref<4x1x128xf32, #tpu.memory_space<vmem>>, vector<4x1x128xf32>
    tpu.vector_store %arg2[%c0_39, %c0_40, %c0_41], %99 {strides = array<i32>} : memref<4x1x128xf32, #tpu.memory_space<vmem>>, vector<4x1x128xf32>,
    return
  }
  func.func @transform_0(%arg0: i32) -> (i32, i32, i32, i32) {
    %c0_i32 = arith.constant 0 : i32
    %c0_i32_0 = arith.constant 0 : i32
    %c0_i32_1 = arith.constant 0 : i32
    %c0_i32_2 = arith.constant 0 : i32
    return %c0_i32, %arg0, %c0_i32_0, %c0_i32_1 : i32, i32, i32, i32
  }
  func.func @transform_1(%arg0: i32) -> (i32, i32, i32) {
    %c0_i32 = arith.constant 0 : i32
    %c0_i32_0 = arith.constant 0 : i32
    %c0_i32_1 = arith.constant 0 : i32
    return %arg0, %c0_i32, %c0_i32_0 : i32, i32, i32
  }
}

</mosaic_0001>

<bundles_post_ra>
// kernel: tpu_custom_call.1
= control target key start
LH: loop header
LB: loop body
LE: loop exit
PB: predicated region body
PF: predicated region fallthrough
CT: control target
= control target key end

     0   :  { %6 = vsyncpa [#allocation3], 0  ;;  %s660_s0 = inlined_call_operand.hbm [shape: f32[2,4,8,128], index: 0, kind: input, shape index: {}]   ;;  %s661_s1 = inlined_call_operand.hbm [shape: f32[4,1,128], index: 1, kind: output, shape index: {}]  }
   0x1   :  { %7 = vsyncpa [#allocation4], 0  ;;  %s441_s6 = smov [#allocation2]   ;;  %s393_s10 = scalar_lea.hbm %s660_s0, 1024 }
   0x2   :  { %s13_s7 = sshll.u32 %s441_s6, 4  ;;  %p394_p0 = scmp.ne.s32.totalorder %s660_s0, %s393_s10  ;;  %s14_s7 = int_to_ptr.vmem [resolvable:$true] %s13_s7 }
   0x3   :  { %p397_p1 = scmp.lt.u32.totalorder %s393_s10, %s660_s0 }
   0x5   :  { %p399_p2 = pnand %p397_p1, %p394_p0 }
   0x7   :  { %402 = shalt.err (!%p399_p2)
}
   0x8   :  { %s403_s15 = scalar_lea.vmem %s14_s7, 1024  ;;  %p408_p4 = scmp.lt.s32.totalorder %s14_s7, %s14_s7 }
   0x9   :  { %p404_p3 = scmp.ne.s32.totalorder %s14_s7, %s403_s15  ;;  %p409_p5 = scmp.lt.s32.totalorder %s403_s15, %s403_s15 }
   0xb   :  { %p410_p6 = por %p409_p5, %p408_p4 }
   0xd   :  { %p411_p7 = pnand %p410_p6, %p404_p3 }
   0xf   :  { %414 = shalt.err (!%p411_p7)
}
  0x10   :  { %s442_s16 = smov 128   ;;  %s443_s17 = smov 8  }
  0x11   :  { %19 = dma.hbm_to_vmem [thread:$0]  %s660_s0, 1024, %s14_s7, [#allocation3], %s442_s16, %s442_s16, %s443_s17  }
  0x12   :  { %437 = dma.done.wait [#allocation3], 1024  }
  0x13   :  { %438 = vsyncadd [#allocation3], 4294966272  ;;  %v25_v0 = vld [vmem:[#allocation2 + $0x10] sm:$0xff]  ;;  %v23_v2 = vld [vmem:[#allocation2] sm:$0xff]  ;;  %v444_v47 = vmov 0.0   ;;  %s446_s0 = smov [#allocation5]  }
  0x14   :  { %v30_v1 = vld [vmem:[#allocation2 + $0x30] sm:$0xff]  ;;  %v28_v4 = vld [vmem:[#allocation2 + $0x20] sm:$0xff]  ;;  %v26_v5 = vld [vmem:[#allocation2 + $0x18] sm:$0xff]  ;;  %s365_s20 = sshll.u32 %s446_s0, 4  ;;  %s366_s20 = int_to_ptr.vmem [resolvable:$true] %s365_s20 }
  0x15   :  { %v34_v3 = vsub.f32 %v30_v1, %v25_v0  ;;  %v31_v6 = vld [vmem:[#allocation2 + $0x38] sm:$0xff]  ;;  %v32_v7 = vsub.f32 %v28_v4, %v23_v2  ;;  %v24_v9 = vld [vmem:[#allocation2 + $0x8] sm:$0xff]  ;;  %s415_s21 = scalar_lea.vmem %s366_s20, 64  ;;  %p420_p9 = scmp.lt.s32.totalorder %s366_s20, %s366_s20 }
  0x16   :  { %v35_v8 = vsub.f32 %v31_v6, %v26_v5  ;;  %v29_v10 = vld [vmem:[#allocation2 + $0x28] sm:$0xff]  ;;  %p416_p8 = scmp.ne.s32.totalorder %s366_s20, %s415_s21  ;;  %p421_p10 = scmp.lt.s32.totalorder %s415_s21, %s415_s21 }
  0x17   :  { %vm38_vm0 = vcmp.eq.f32.partialorder %v34_v3, inf  ;;  %vm42_vm1 = vcmp.ne.f32.partialorder %v34_v3, %v34_v3  ;;  %v33_v11 = vsub.f32 %v29_v10, %v24_v9  ;;  %vm36_vm3 = vcmp.eq.f32.partialorder %v32_v7, inf }
  0x18   :  { %vm46_vm2 = vmor %vm38_vm0, %vm42_vm1  ;;  %vm40_vm4 = vcmp.ne.f32.partialorder %v32_v7, %v32_v7  ;;  %vm39_vm5 = vcmp.eq.f32.partialorder %v35_v8, inf  ;;  %vm43_vm6 = vcmp.ne.f32.partialorder %v35_v8, %v35_v8  ;;  %p422_p11 = por %p421_p10, %p420_p9 }
  0x19   :  { %v50_v12 = vsel %vm46_vm2, 0.0, %v34_v3  ;;  %vm44_vm7 = vmor %vm36_vm3, %vm40_vm4  ;;  %vm37_vm8 = vcmp.eq.f32.partialorder %v33_v11, inf  ;;  %vm41_vm9 = vcmp.ne.f32.partialorder %v33_v11, %v33_v11 }
  0x1a   :  { %56 = vmax.xlane.f32.xlu1 %v50_v12  ;;  %v48_v13 = vsel %vm44_vm7, 0.0, %v32_v7  ;;  %vm47_vm10 = vmor %vm39_vm5, %vm43_vm6  ;;  %p423_p12 = pnand %p422_p11, %p416_p8 }
  0x1b   :  { %52 = vmax.xlane.f32.xlu0 %v48_v13  ;;  %v51_v14 = vsel %vm47_vm10, 0.0, %v35_v8  ;;  %vm45_vm11 = vmor %vm37_vm8, %vm41_vm9 }
  0x1c   :  { %v49_v15 = vsel %vm45_vm11, 0.0, %v33_v11 }
  0x1e   :  { %58 = vmax.xlane.f32.xlu1 %v51_v14 }
  0x1f   :  { %54 = vmax.xlane.f32.xlu0 %v49_v15 }
  0xa7   :  { %v57_v16 = vpop.xlane.xlu1 %56 }
  0xa8   :  { %v72_v17 = vrot.slane %v57_v16, 4  ;;  %v53_v18 = vpop.xlane.xlu0 %52 }
  0xa9   :  { %v60_v19 = vrot.slane %v53_v18, 4 }
  0xaa   :  { %v73_v20 = vmax.f32 %v57_v16, %v72_v17 }
  0xab   :  { %v61_v21 = vmax.f32 %v53_v18, %v60_v19  ;;  %v59_v22 = vpop.xlane.xlu1 %58 }
  0xac   :  { %v74_v23 = vrot.slane %v73_v20, 2  ;;  %v78_v24 = vrot.slane %v59_v22, 4  ;;  %v55_v25 = vpop.xlane.xlu0 %54 }
  0xad   :  { %v62_v26 = vrot.slane %v61_v21, 2  ;;  %v66_v27 = vrot.slane %v55_v25, 4 }
  0xae   :  { %v75_v28 = vmax.f32 %v73_v20, %v74_v23  ;;  %v79_v29 = vmax.f32 %v59_v22, %v78_v24 }
  0xaf   :  { %v63_v30 = vmax.f32 %v61_v21, %v62_v26  ;;  %v67_v31 = vmax.f32 %v55_v25, %v66_v27 }
  0xb0   :  { %v76_v32 = vrot.slane %v75_v28, 1  ;;  %v80_v33 = vrot.slane %v79_v29, 2 }
  0xb1   :  { %v64_v34 = vrot.slane %v63_v30, 1  ;;  %v68_v35 = vrot.slane %v67_v31, 2 }
  0xb2   :  { %v81_v36 = vmax.f32 %v79_v29, %v80_v33  ;;  %v471_v37 = vmax.f32 %v75_v28, %v76_v32 }
  0xb3   :  { %v473_v38 = vmax.f32 %v63_v30, %v64_v34  ;;  %v69_v39 = vmax.f32 %v67_v31, %v68_v35 }
  0xb4   :  { %v82_v40 = vrot.slane %v81_v36, 1  ;;  %vm86_vm13 = vcmp.eq.f32.partialorder %v50_v12, %v471_v37 }
  0xb5   :  { %v70_v41 = vrot.slane %v69_v39, 1  ;;  %vm84_vm12 = vcmp.eq.f32.partialorder %v48_v13, %v473_v38  ;;  %v126_v45 = vsel %vm86_vm13, -inf, %v50_v12  ;;  %v90_v50 = vsel %vm86_vm13, 1.0, %v444_v47 }
  0xb6   :  { %v124_v42 = vsel %vm84_vm12, -inf, %v48_v13  ;;  %v476_v43 = vmax.f32 %v81_v36, %v82_v40  ;;  %v88_v48 = vsel %vm84_vm12, 1.0, %v444_v47  ;;  %vm252_vm8 = vcmp.gt.f32.partialorder %v473_v38, -inf }
  0xb7   :  { %v478_v44 = vmax.f32 %v69_v39, %v70_v41  ;;  %128 = vmax.xlane.f32.xlu0 %v124_v42 }
  0xb8   :  { %vm87_vm15 = vcmp.eq.f32.partialorder %v51_v14, %v476_v43 }
  0xb9   :  { %vm85_vm14 = vcmp.eq.f32.partialorder %v49_v15, %v478_v44  ;;  %v127_v49 = vsel %vm87_vm15, -inf, %v51_v14  ;;  %v91_v52 = vsel %vm87_vm15, 1.0, %v444_v47  ;;  %vm253_vm12 = vcmp.gt.f32.partialorder %v478_v44, -inf }
  0xba   :  { %v125_v46 = vsel %vm85_vm14, -inf, %v49_v15  ;;  %v89_v51 = vsel %vm85_vm14, 1.0, %v444_v47  ;;  %vm445_vm14 = vmmov 1  }
  0xbb   :  { %132 = vmax.xlane.f32.xlu0 %v126_v45  ;;  %130 = vmax.xlane.f32.xlu1 %v125_v46 }
  0xbf   :  { %92 = vadd.xlane.f32.xlu0 %v88_v48  ;;  %134 = vmax.xlane.f32.xlu1 %v127_v49 }
  0xc3   :  { %96 = vadd.xlane.f32.xlu0 %v90_v50  ;;  %94 = vadd.xlane.f32.xlu1 %v89_v51 }
  0xc7   :  { %98 = vadd.xlane.f32.xlu1 %v91_v52 }
 0x144   :  { %v129_v53 = vpop.xlane.xlu0 %128 }
 0x145   :  { %v136_v54 = vrot.slane %v129_v53, 4 }
 0x147   :  { %v137_v55 = vmax.f32 %v129_v53, %v136_v54 }
 0x148   :  { %v131_v56 = vpop.xlane.xlu1 %130  ;;  %v133_v57 = vpop.xlane.xlu0 %132 }
 0x149   :  { %v138_v58 = vrot.slane %v137_v55, 2  ;;  %v142_v59 = vrot.slane %v131_v56, 4  ;;  %v148_v60 = vrot.slane %v133_v57, 4 }
 0x14b   :  { %v139_v61 = vmax.f32 %v137_v55, %v138_v58  ;;  %v143_v62 = vmax.f32 %v131_v56, %v142_v59  ;;  %v149_v63 = vmax.f32 %v133_v57, %v148_v60 }
 0x14c   :  { %v135_v0 = vpop.xlane.xlu1 %134  ;;  %v93_v33 = vpop.xlane.xlu0 %92 }
 0x14d   :  { %v140_v1 = vrot.slane %v139_v61, 1  ;;  %v144_v2 = vrot.slane %v143_v62, 2  ;;  %v150_v3 = vrot.slane %v149_v63, 2  ;;  %v154_v4 = vrot.slane %v135_v0, 4 }
 0x14e   :  { %v100_v35 = vrot.slane %v93_v33, 4 }
 0x14f   :  { %v483_v5 = vmax.f32 %v139_v61, %v140_v1  ;;  %v145_v6 = vmax.f32 %v143_v62, %v144_v2  ;;  %v151_v7 = vmax.f32 %v149_v63, %v150_v3  ;;  %v155_v8 = vmax.f32 %v135_v0, %v154_v4 }
 0x150   :  { %v95_v34 = vpop.xlane.xlu1 %94  ;;  %v97_v39 = vpop.xlane.xlu0 %96  ;;  %v101_v40 = vadd.f32 %v100_v35, %v93_v33 }
 0x151   :  { %v146_v9 = vrot.slane %v145_v6, 1  ;;  %v152_v10 = vrot.slane %v151_v7, 1  ;;  %v156_v11 = vrot.slane %v155_v8, 2  ;;  %vm160_vm0 = vcmp.eq.f32.partialorder %v124_v42, %v483_v5 }
 0x152   :  { %v164_v15 = vsel %vm160_vm0, 1.0, %v444_v47  ;;  %v200_v17 = vsel %vm160_vm0, -inf, %v124_v42  ;;  %v106_v36 = vrot.slane %v95_v34, 4  ;;  %v112_v42 = vrot.slane %v97_v39, 4 }
 0x153   :  { %v486_v12 = vmax.f32 %v145_v6, %v146_v9  ;;  %v488_v13 = vmax.f32 %v151_v7, %v152_v10  ;;  %v157_v14 = vmax.f32 %v155_v8, %v156_v11  ;;  %168 = vadd.xlane.f32.xlu0 %v164_v15  ;;  %vm204_vm4 = vcmp.gt.f32.partialorder %v200_v17, -inf }
 0x154   :  { %v208_v25 = vsel %vm204_vm4, %v200_v17, 0.0  ;;  %v107_v41 = vadd.f32 %v106_v36, %v95_v34  ;;  %v113_v48 = vadd.f32 %v112_v42, %v97_v39  ;;  %vm292_vm10 = vcmp.gt.f32.partialorder %v483_v5, -inf }
 0x155   :  { %v158_v16 = vrot.slane %v157_v14, 1  ;;  %vm161_vm1 = vcmp.eq.f32.partialorder %v125_v46, %v486_v12  ;;  %vm162_vm2 = vcmp.eq.f32.partialorder %v126_v45, %v488_v13  ;;  %v212_v26 = vmul.f32 %v208_v25, %v208_v25 }
 0x156   :  { %v165_v18 = vsel %vm161_vm1, 1.0, %v444_v47  ;;  %v201_v20 = vsel %vm161_vm1, -inf, %v125_v46  ;;  %v166_v21 = vsel %vm162_vm2, 1.0, %v444_v47  ;;  %v202_v22 = vsel %vm162_vm2, -inf, %v126_v45  ;;  %v99_v45 = vpop.xlane.xlu1 %98 }
 0x157   :  { %v491_v19 = vmax.f32 %v157_v14, %v158_v16  ;;  %170 = vadd.xlane.f32.xlu1 %v165_v18  ;;  %172 = vadd.xlane.f32.xlu0 %v166_v21  ;;  %vm205_vm5 = vcmp.gt.f32.partialorder %v201_v20, -inf  ;;  %vm206_vm6 = vcmp.gt.f32.partialorder %v202_v22, -inf  ;;  %v102_v46 = vrot.slane %v101_v40, 2 }
 0x158   :  { %v209_v27 = vsel %vm205_vm5, %v201_v20, 0.0  ;;  %v210_v29 = vsel %vm206_vm6, %v202_v22, 0.0  ;;  %v114_v52 = vrot.slane %v113_v48, 2  ;;  %vm293_vm5 = vcmp.gt.f32.partialorder %v486_v12, -inf }
 0x159   :  { %vm163_vm3 = vcmp.eq.f32.partialorder %v127_v49, %v491_v19  ;;  %v213_v28 = vmul.f32 %v209_v27, %v209_v27  ;;  %v214_v31 = vmul.f32 %v210_v29, %v210_v29  ;;  %v103_v50 = vadd.f32 %v102_v46, %v101_v40 }
 0x15a   :  { %v167_v23 = vsel %vm163_vm3, 1.0, %v444_v47  ;;  %v203_v24 = vsel %vm163_vm3, -inf, %v127_v49  ;;  %v108_v47 = vrot.slane %v107_v41, 2  ;;  %v118_v49 = vrot.slane %v99_v45, 4 }
 0x15b   :  { %174 = vadd.xlane.f32.xlu1 %v167_v23  ;;  %216 = vadd.xlane.f32.xlu0 %v212_v26  ;;  %vm207_vm7 = vcmp.gt.f32.partialorder %v203_v24, -inf  ;;  %v104_v54 = vrot.slane %v103_v50, 1  ;;  %v115_v56 = vadd.f32 %v114_v52, %v113_v48 }
 0x15c   :  { %v211_v30 = vsel %vm207_vm7, %v203_v24, 0.0  ;;  %v109_v51 = vadd.f32 %v108_v47, %v107_v41  ;;  %v119_v53 = vadd.f32 %v118_v49, %v99_v45 }
 0x15d   :  { %v215_v32 = vmul.f32 %v211_v30, %v211_v30  ;;  %v495_v60 = vadd.f32 %v104_v54, %v103_v50  ;;  %v116_v1 = vrot.slane %v115_v56, 1 }
 0x15e   :  { %v110_v55 = vrot.slane %v109_v51, 1  ;;  %v120_v57 = vrot.slane %v119_v53, 2 }
 0x15f   :  { %218 = vadd.xlane.f32.xlu1 %v213_v28  ;;  %220 = vadd.xlane.f32.xlu0 %v214_v31  ;;  %v377_v8 = vadd.f32 -2.0, %v495_v60  ;;  %v501_v17 = vadd.f32 %v116_v1, %v115_v56  ;;  %vm256_vm9 = vcmp.ge.f32.partialorder %v495_v60, 2.0 }
 0x160   :  { %v497_v61 = vadd.f32 %v110_v55, %v109_v51  ;;  %v121_v2 = vadd.f32 %v120_v57, %v119_v53  ;;  %vm296_vm15 = vmxor %vm256_vm9, %vm445_vm14 }
 0x161   :  { %v268_v25 = vmul.f32 %v377_v8, %v473_v38  ;;  %vm528_vm2 = vmand %vm256_vm9, %vm252_vm8  ;;  %vm258_vm6 = vcmp.ge.f32.partialorder %v501_v17, 2.0  ;;  %vm254_vm8 = vcmp.gt.f32.partialorder %v471_v37, -inf }
 0x162   :  { %v378_v9 = vadd.f32 -2.0, %v497_v61  ;;  %v122_v18 = vrot.slane %v121_v2, 1  ;;  %vm257_vm11 = vcmp.ge.f32.partialorder %v497_v61, 2.0 }
 0x163   :  { %222 = vadd.xlane.f32.xlu1 %v215_v32  ;;  %v272_v42 = vmul.f32 %v268_v25, %v473_v38  ;;  %vm297_vm3 = vmxor %vm257_vm11, %vm445_vm14 }
 0x164   :  { %v269_v27 = vmul.f32 %v378_v9, %v478_v44  ;;  %v508_v33 = vadd.f32 %v122_v18, %v121_v2 }
 0x166   :  { %v273_v46 = vmul.f32 %v269_v27, %v478_v44 }
 0x1e0   :  { %v169_v58 = vpop.xlane.xlu0 %168 }
 0x1e1   :  { %v176_v59 = vrot.slane %v169_v58, 4 }
 0x1e3   :  { %v177_v63 = vadd.f32 %v176_v59, %v169_v58 }
 0x1e4   :  { %v171_v62 = vpop.xlane.xlu1 %170  ;;  %v173_v3 = vpop.xlane.xlu0 %172 }
 0x1e5   :  { %v182_v0 = vrot.slane %v171_v62, 4  ;;  %v178_v4 = vrot.slane %v177_v63, 2  ;;  %v188_v7 = vrot.slane %v173_v3, 4 }
 0x1e7   :  { %v183_v6 = vadd.f32 %v182_v0, %v171_v62  ;;  %v179_v11 = vadd.f32 %v178_v4, %v177_v63  ;;  %v189_v15 = vadd.f32 %v188_v7, %v173_v3  ;;  %v276_v7 = vsel %vm528_vm2, %v272_v42, 0.0 }
 0x1e8   :  { %v175_v10 = vpop.xlane.xlu1 %174  ;;  %v217_v24 = vpop.xlane.xlu0 %216 }
 0x1e9   :  { %v184_v14 = vrot.slane %v183_v6, 2  ;;  %v194_v16 = vrot.slane %v175_v10, 4  ;;  %v180_v20 = vrot.slane %v179_v11, 1  ;;  %v190_v22 = vrot.slane %v189_v15, 2 }
 0x1ea   :  { %v224_v26 = vrot.slane %v217_v24, 4 }
 0x1eb   :  { %v185_v21 = vadd.f32 %v184_v14, %v183_v6  ;;  %v195_v23 = vadd.f32 %v194_v16, %v175_v10  ;;  %v181_v29 = vadd.f32 %v180_v20, %v179_v11  ;;  %v191_v31 = vadd.f32 %v190_v22, %v189_v15 }
 0x1ec   :  { %v219_v28 = vpop.xlane.xlu1 %218  ;;  %v225_v34 = vadd.f32 %v224_v26, %v217_v24  ;;  %v221_v1 = vpop.xlane.xlu0 %220  ;;  %v379_v6 = vadd.f32 -2.0, %v501_v17  ;;  %v380_v26 = vadd.f32 -2.0, %v508_v33 }
 0x1ed   :  { %v186_v30 = vrot.slane %v185_v21, 1  ;;  %v196_v32 = vrot.slane %v195_v23, 2  ;;  %v230_v35 = vrot.slane %v219_v28, 4  ;;  %v288_v36 = vadd.f32 %v181_v29, %v495_v60 }
 0x1ee   :  { %v192_v40 = vrot.slane %v191_v31, 1  ;;  %v226_v45 = vrot.slane %v225_v34, 2  ;;  %v236_v15 = vrot.slane %v221_v1, 4  ;;  %v270_v25 = vmul.f32 %v379_v6, %v471_v37 }
 0x1ef   :  { %v187_v39 = vadd.f32 %v186_v30, %v185_v21  ;;  %v197_v41 = vadd.f32 %v196_v32, %v195_v23  ;;  %v231_v47 = vadd.f32 %v230_v35, %v219_v28  ;;  %vm300_vm13 = vcmp.ge.f32.partialorder %v288_v36, 2.0 }
 0x1f0   :  { %v381_v48 = vadd.f32 -2.0, %v288_v36  ;;  %v336_v49 = vsub.f32 %v288_v36, %v495_v60  ;;  %v193_v51 = vadd.f32 %v192_v40, %v191_v31  ;;  %v227_v53 = vadd.f32 %v226_v45, %v225_v34  ;;  %vm304_vm1 = vmand %vm296_vm15, %vm300_vm13  ;;  %v223_v27 = vpop.xlane.xlu1 %222 }
 0x1f1   :  { %v289_v50 = vadd.f32 %v187_v39, %v497_v61  ;;  %v198_v52 = vrot.slane %v197_v41, 1  ;;  %v232_v54 = vrot.slane %v231_v47, 2  ;;  %vm543_vm4 = vmand %vm304_vm1, %vm292_vm10  ;;  %v237_v35 = vadd.f32 %v236_v15, %v221_v1 }
 0x1f2   :  { %v316_v55 = vmul.f32 %v381_v48, %v483_v5  ;;  %v340_v56 = vmul.f32 %v336_v49, %v483_v5  ;;  %v290_v59 = vadd.f32 %v193_v51, %v501_v17  ;;  %v228_v0 = vrot.slane %v227_v53, 1  ;;  %vm563_vm13 = vmand %vm257_vm11, %vm253_vm12 }
 0x1f3   :  { %vm301_vm0 = vcmp.ge.f32.partialorder %v289_v50, 2.0  ;;  %v382_v57 = vadd.f32 -2.0, %v289_v50  ;;  %v337_v58 = vsub.f32 %v289_v50, %v497_v61  ;;  %v199_v62 = vadd.f32 %v198_v52, %v197_v41  ;;  %vm593_vm1 = vmand %vm257_vm11, %vm293_vm5 }
 0x1f4   :  { %v320_v3 = vmul.f32 %v316_v55, %v483_v5  ;;  %v233_v4 = vadd.f32 %v232_v54, %v231_v47  ;;  %v344_v10 = vmul.f32 %v340_v56, %v483_v5  ;;  %v229_v11 = vadd.f32 %v228_v0, %v227_v53  ;;  %vm552_vm7 = vmand %vm297_vm3, %vm301_vm0 }
 0x1f5   :  { %v317_v2 = vmul.f32 %v382_v57, %v486_v12  ;;  %v341_v38 = vmul.f32 %v337_v58, %v486_v12  ;;  %v291_v9 = vadd.f32 %v199_v62, %v508_v33  ;;  %v383_v16 = vadd.f32 -2.0, %v290_v59  ;;  %vm577_vm12 = vmand %vm552_vm7, %vm293_vm5 }
 0x1f6   :  { %v324_v18 = vsel %vm543_vm4, %v320_v3, 0.0  ;;  %v234_v22 = vrot.slane %v233_v4, 1  ;;  %v280_v23 = vadd.f32 %v276_v7, %v229_v11  ;;  %v277_v24 = vsel %vm563_vm13, %v273_v46, 0.0  ;;  %vm332_vm0 = vmand %vm256_vm9, %vm292_vm10 }
 0x1f7   :  { %v321_v21 = vmul.f32 %v317_v2, %v486_v12  ;;  %vm302_vm15 = vcmp.ge.f32.partialorder %v290_v59, 2.0  ;;  %v338_v44 = vsub.f32 %v290_v59, %v501_v17  ;;  %v345_v29 = vmul.f32 %v341_v38, %v486_v12  ;;  %vm298_vm10 = vmxor %vm258_vm6, %vm445_vm14 }
 0x1f8   :  { %v235_v30 = vadd.f32 %v234_v22, %v233_v4  ;;  %v384_v31 = vadd.f32 -2.0, %v291_v9  ;;  %v328_v32 = vadd.f32 %v324_v18, %v280_v23  ;;  %v348_v36 = vsel %vm332_vm0, %v344_v10, 0.0  ;;  %vm306_vm11 = vmand %vm298_vm10, %vm302_vm15 }
 0x1f9   :  { %v325_v34 = vsel %vm577_vm12, %v321_v21, 0.0  ;;  %v318_v40 = vmul.f32 %v383_v16, %v488_v13  ;;  %v242_v41 = vrot.slane %v223_v27, 4  ;;  %v238_v60 = vrot.slane %v237_v35, 2  ;;  %vm613_vm3 = vmand %vm258_vm6, %vm254_vm8 }
 0x1fa   :  { %v281_v39 = vadd.f32 %v277_v24, %v235_v30  ;;  %v352_v42 = vadd.f32 %v348_v36, %v328_v32  ;;  %vm259_vm9 = vcmp.ge.f32.partialorder %v508_v33, 2.0  ;;  %v271_v45 = vmul.f32 %v380_v26, %v476_v43 }
 0x1fb   :  { %v342_v46 = vmul.f32 %v338_v44, %v488_v13  ;;  %v274_v48 = vmul.f32 %v270_v25, %v471_v37  ;;  %v243_v12 = vadd.f32 %v242_v41, %v223_v27  ;;  %v339_v61 = vsub.f32 %v291_v9, %v508_v33  ;;  %vm299_vm5 = vmxor %vm259_vm9, %vm445_vm14 }
 0x1fc   :  { %v329_v47 = vadd.f32 %v325_v34, %v281_v39  ;;  %356 = vst [vmem:[#allocation5] sm:$0x1] %v352_v42  ;;  %v349_v49 = vsel %vm593_vm1, %v345_v29, 0.0  ;;  %v239_v50 = vadd.f32 %v238_v60, %v237_v35  ;;  %v319_v51 = vmul.f32 %v384_v31, %v491_v19 }
 0x1fd   :  { %vm303_vm2 = vcmp.ge.f32.partialorder %v291_v9, 2.0  ;;  %v322_v54 = vmul.f32 %v318_v40, %v488_v13  ;;  %v244_v55 = vrot.slane %v243_v12, 2  ;;  %vm294_vm4 = vcmp.gt.f32.partialorder %v488_v13, -inf }
 0x1fe   :  { %v353_v52 = vadd.f32 %v349_v49, %v329_v47  ;;  %v240_v56 = vrot.slane %v239_v50, 1  ;;  %vm624_vm7 = vmand %vm306_vm11, %vm294_vm4  ;;  %vm255_vm8 = vcmp.gt.f32.partialorder %v476_v43, -inf  ;;  %v343_v58 = vmul.f32 %v339_v61, %v491_v19 }
 0x1ff   :  { %v245_v57 = vadd.f32 %v244_v55, %v243_v12  ;;  %v275_v62 = vmul.f32 %v271_v45, %v476_v43  ;;  %vm307_vm13 = vmand %vm299_vm5, %vm303_vm2  ;;  %v323_v63 = vmul.f32 %v319_v51, %v491_v19  ;;  %v278_v0 = vsel %vm613_vm3, %v274_v48, 0.0 }
 0x200   :  { %357 = vst [vmem:[#allocation5 + $0x1] sm:$0x1] %v353_v52  ;;  %v241_v59 = vadd.f32 %v240_v56, %v239_v50  ;;  %v326_v1 = vsel %vm624_vm7, %v322_v54, 0.0  ;;  %v346_v2 = vmul.f32 %v342_v46, %v488_v13  ;;  %vm263_vm14 = vmand %vm259_vm9, %vm255_vm8  ;;  %vm295_vm15 = vcmp.gt.f32.partialorder %v491_v19, -inf }
 0x201   :  { %v246_v3 = vrot.slane %v245_v57, 1  ;;  %vm311_vm12 = vmand %vm307_vm13, %vm295_vm15  ;;  %v279_v38 = vsel %vm263_vm14, %v275_v62, 0.0  ;;  %v347_v8 = vmul.f32 %v343_v58, %v491_v19 }
 0x202   :  { %v282_v4 = vadd.f32 %v278_v0, %v241_v59  ;;  %vm334_vm0 = vmand %vm258_vm6, %vm294_vm4  ;;  %v327_v7 = vsel %vm311_vm12, %v323_v63, 0.0 }
 0x203   :  { %v247_v43 = vadd.f32 %v246_v3, %v245_v57  ;;  %v350_v9 = vsel %vm334_vm0, %v346_v2, 0.0  ;;  %vm335_vm1 = vmand %vm259_vm9, %vm295_vm15 }
 0x204   :  { %v330_v6 = vadd.f32 %v326_v1, %v282_v4  ;;  %v351_v15 = vsel %vm335_vm1, %v347_v8, 0.0 }
 0x205   :  { %v283_v10 = vadd.f32 %v279_v38, %v247_v43 }
 0x206   :  { %v354_v11 = vadd.f32 %v350_v9, %v330_v6 }
 0x207   :  { %v331_v14 = vadd.f32 %v327_v7, %v283_v10 }
 0x208   :  { %358 = vst [vmem:[#allocation5 + $0x2] sm:$0x1] %v354_v11 }
 0x209   :  { %v355_v13 = vadd.f32 %v351_v15, %v331_v14 }
 0x20b   :  { %359 = vst [vmem:[#allocation5 + $0x3] sm:$0x1] %v355_v13 }
 0x20c   :  { %426 = shalt.err (!%p423_p12)
}
 0x20d   :  { %s427_s24 = scalar_lea.hbm %s661_s1, 64 }
 0x20e   :  { %p428_p13 = scmp.ne.s32.totalorder %s661_s1, %s427_s24  ;;  %p431_p0 = scmp.lt.u32.totalorder %s427_s24, %s661_s1 }
 0x210   :  { %p433_p1 = pnand %p431_p0, %p428_p13 }
 0x212   :  { %436 = shalt.err (!%p433_p1)
}
 0x213   :  { %s447_s29 = smov 16   ;;  %s448_s30 = smov 1  }
 0x214   :  { %371 = dma.vmem_to_hbm [thread:$0]  %s366_s20, 64, %s661_s1, [#allocation4], %s447_s29, %s447_s29, %s448_s30  }
 0x215   :  { %439 = dma.done.wait [#allocation4], 64  }
 0x216   :  { %440 = vsyncadd [#allocation4], 4294967232 }
 0x217   :  { %375 = vsyncpa [#allocation3], 1 }
 0x218   :  { %376 = vsyncpa [#allocation4], 1 }

</bundles_post_ra>
